<compile_context>
chip_gen: v7x
topology: tpu7x:2x2x1
jax: 0.10.0
libtpu: 0.0.40
codegen_flags: <defaults>
</compile_context>

<pallas_src>
import jax
import jax.numpy as jnp
from jax.experimental import pallas as pl
from jax.experimental.pallas import tpu as pltpu


# --------------------------------------------------------------------------
# Gridless fast path: whole problem fits comfortably in VMEM.
# --------------------------------------------------------------------------
def _ensemble_gridless_kernel(wvec_ref, x_ref, W_ref, beff_ref, o_ref):
    # wvec_ref : SMEM (E,)            normalized ensemble weights
    # x_ref    : VMEM (B, D_in)
    # W_ref    : VMEM (E, D_in, D_out)
    # beff_ref : VMEM (1, D_out)      precombined bias (f32)
    # o_ref    : VMEM (B, D_out)
    E = W_ref.shape[0]
    # Combine weights on the VPU (static unrolled loop over the small E axis).
    w_eff = wvec_ref[0] * W_ref[0].astype(jnp.float32)
    for e in range(1, E):
        w_eff = w_eff + wvec_ref[e] * W_ref[e].astype(jnp.float32)
    # Single MXU matmul for the whole ensemble.
    y = jnp.dot(x_ref[...].astype(jnp.float32), w_eff,
                preferred_element_type=jnp.float32)
    o_ref[...] = (y + beff_ref[...]).astype(o_ref.dtype)


# --------------------------------------------------------------------------
# Tiled path: grid = (num_D_out_tiles, E); D_out tiles parallel, E reduction.
# --------------------------------------------------------------------------
def _ensemble_tiled_kernel(wvec_ref, x_ref, W_ref, beff_ref, o_ref, weff_ref):
    # wvec_ref : SMEM (E,)               normalized ensemble weights (prefetch)
    # x_ref    : VMEM (B, D_in)          resident across the whole grid
    # W_ref    : VMEM (D_in, T)          model-e slab, D_out tile j (E dim squeezed)
    # beff_ref : VMEM (1, T)             precombined bias tile
    # o_ref    : VMEM (B, T)             written on the last reduction step
    # weff_ref : VMEM (D_in, T) f32      effective-weight accumulator scratch
    e = pl.program_id(1)

    @pl.when(e == 0)
    def _():
        weff_ref[...] = jnp.zeros_like(weff_ref)

    # Pure VPU scale-add while the next W_e tile is being DMA'd.
    weff_ref[...] += wvec_ref[e] * W_ref[...].astype(jnp.float32)

    @pl.when(e == pl.num_programs(1) - 1)
    def _():
        y = jnp.dot(x_ref[...].astype(jnp.float32), weff_ref[...],
                    preferred_element_type=jnp.float32)
        o_ref[...] = (y + beff_ref[...]).astype(o_ref.dtype)


def _choose_dout_tile(d_out):
    # Largest lane-dense tile that divides D_out; fall back to the full dim.
    for t in (512, 256, 128):
        if d_out % t == 0:
            return t
    return d_out


def model_ensemble_forward(x, W_stack, b_stack, weights, *,
                           stream_dtype=None,
                           small_bytes_threshold=4 * 1024 * 1024):
    """Ensemble of Linear models.

    x        : (B, D_in)
    W_stack  : (E, D_in, D_out)   per-model weights, pre-transposed
    b_stack  : (E, D_out)         per-model biases
    weights  : (E,)               un-normalized ensemble weights (like the ctor arg)
    stream_dtype : optionally cast W_stack (e.g. jnp.bfloat16) to halve HBM traffic;
                   accumulation stays in float32.
    """
    B, D_in = x.shape
    E, _, D_out = W_stack.shape

    # Normalize exactly like the PyTorch module's __init__.
    w_norm = (weights / jnp.sum(weights)).astype(jnp.float32)
    # Precombine the bias (reviewer suggestion): b_eff = sum_e w_e * b_e.
    b_eff = jnp.sum(w_norm[:, None] * b_stack.astype(jnp.float32),
                    axis=0, keepdims=True)  # (1, D_out) f32

    if stream_dtype is not None:
        W_stack = W_stack.astype(stream_dtype)

    w_bytes = E * D_in * D_out * jnp.dtype(W_stack.dtype).itemsize

    # ---------------- small problems: gridless single invocation ----------
    if w_bytes <= small_bytes_threshold:
        return pl.pallas_call(
            _ensemble_gridless_kernel,
            out_shape=jax.ShapeDtypeStruct((B, D_out), x.dtype),
            in_specs=[
                pl.BlockSpec(memory_space=pltpu.MemorySpace.SMEM),   # weights
                pl.BlockSpec(memory_space=pltpu.MemorySpace.VMEM),   # x
                pl.BlockSpec(memory_space=pltpu.MemorySpace.VMEM),   # W_stack
                pl.BlockSpec(memory_space=pltpu.MemorySpace.VMEM),   # b_eff
            ],
            out_specs=pl.BlockSpec(memory_space=pltpu.MemorySpace.VMEM),
        )(w_norm, x, W_stack, b_eff)

    # ---------------- large problems: (D_out tile, E) grid -----------------
    tile = _choose_dout_tile(D_out)
    n_tiles = pl.cdiv(D_out, tile)

    grid_spec = pltpu.PrefetchScalarGridSpec(
        num_scalar_prefetch=1,
        grid=(n_tiles, E),                                   # E (reduction) last
        in_specs=[
            pl.BlockSpec((B, D_in), lambda j, e, w: (0, 0)),                   # x resident
            pl.BlockSpec((pl.Squeezed(), D_in, tile), lambda j, e, w: (e, 0, j)),  # W_e tile
            pl.BlockSpec((1, tile), lambda j, e, w: (0, j)),                   # b_eff tile
        ],
        out_specs=pl.BlockSpec((B, tile), lambda j, e, w: (0, j)),
        scratch_shapes=[pltpu.VMEM((D_in, tile), jnp.float32)],                # W_eff acc
    )

    return pl.pallas_call(
        _ensemble_tiled_kernel,
        out_shape=jax.ShapeDtypeStruct((B, D_out), x.dtype),
        grid_spec=grid_spec,
        compiler_params=pltpu.CompilerParams(
            # D_out tiles independent -> megacore sharding on v7x; E is the reduction.
            dimension_semantics=("parallel", "arbitrary"),
            vmem_limit_bytes=48 * 1024 * 1024,
        ),
    )(w_norm, x, W_stack, b_eff)


# --------------------------------------------------------------------------
# Pure-JAX reference (same semantics as the PyTorch module with Linear members).
# --------------------------------------------------------------------------
def _ref_forward(x, W_stack, b_stack, weights):
    w = weights / jnp.sum(weights)
    out = jnp.zeros((x.shape[0], W_stack.shape[2]), jnp.float32)
    for i in range(W_stack.shape[0]):
        y = jnp.dot(x, W_stack[i], precision=jax.lax.Precision.HIGHEST)
        out = out + w[i] * (y + b_stack[i])
    return out


if __name__ == "__main__":
    key = jax.random.PRNGKey(0)

    # ---- Config 1: small shapes -> gridless fast path ---------------------
    B, D_in, D_out, E = 8, 32, 128, 3
    k1, k2, k3, key = jax.random.split(key, 4)
    x = jax.random.normal(k1, (B, D_in), dtype=jnp.float32)
    W = jax.random.normal(k2, (E, D_in, D_out), dtype=jnp.float32) * 0.05
    b = jax.random.normal(k3, (E, D_out), dtype=jnp.float32) * 0.01
    wts = jnp.array([1.0, 2.0, 3.0], dtype=jnp.float32)

    out1 = jax.block_until_ready(model_ensemble_forward(x, W, b, wts))
    ref1 = _ref_forward(x, W, b, wts)
    assert jnp.allclose(out1, ref1, atol=1e-4, rtol=1e-4), "gridless path mismatch"

    # ---- Config 2: force the tiled (D_out-tile, E) grid path --------------
    B2, D_in2, D_out2, E2 = 8, 128, 384, 4
    k1, k2, k3, key = jax.random.split(key, 4)
    x2 = jax.random.normal(k1, (B2, D_in2), dtype=jnp.float32)
    W2 = jax.random.normal(k2, (E2, D_in2, D_out2), dtype=jnp.float32) * 0.05
    b2 = jax.random.normal(k3, (E2, D_out2), dtype=jnp.float32) * 0.01
    wts2 = jnp.array([1.0, 0.5, 2.0, 1.5], dtype=jnp.float32)

    out2 = jax.block_until_ready(
        model_ensemble_forward(x2, W2, b2, wts2, small_bytes_threshold=0))
    ref2 = _ref_forward(x2, W2, b2, wts2)
    assert jnp.allclose(out2, ref2, atol=1e-4, rtol=1e-4), "tiled path mismatch"

    # ---- Config 3: bf16 weight streaming (half HBM traffic, f32 accumulate)
    out3 = jax.block_until_ready(
        model_ensemble_forward(x2, W2, b2, wts2, stream_dtype=jnp.bfloat16,
                               small_bytes_threshold=0))
    assert jnp.allclose(out3, ref2, atol=5e-2, rtol=5e-2), "bf16 streaming mismatch"

    print("KERNEL_OK")
</pallas_src>

<mosaic_0001>
module attributes {stable_mosaic.version = 11 : i64} {
  func.func @_ensemble_gridless_kernel(%arg0: memref<3xf32, #tpu.memory_space<smem>>, %arg1: memref<8x32xf32, #tpu.memory_space<vmem>>, %arg2: memref<3x32x128xf32, #tpu.memory_space<vmem>>, %arg3: memref<1x128xf32, #tpu.memory_space<vmem>>, %arg4: memref<8x128xf32, #tpu.memory_space<vmem>>) attributes {dimension_semantics = [], scalar_prefetch = 0 : i64, scratch_operands = 0 : i64, tpu.core_type = #tpu.core_type<tc>} {
    %c0 = arith.constant 0 : index
    %0 = memref.load %arg0[%c0] : memref<3xf32, #tpu.memory_space<smem>>
    %c0_0 = arith.constant 0 : index
    %c0_1 = arith.constant 0 : index
    %c0_2 = arith.constant 0 : index
    %1 = vector.load %arg2[%c0_0, %c0_1, %c0_2] : memref<3x32x128xf32, #tpu.memory_space<vmem>>, vector<1x32x128xf32>
    %2 = vector.shape_cast %1 : vector<1x32x128xf32> to vector<32x128xf32>
    %3 = vector.broadcast %0 : f32 to vector<32x128xf32>
    %4 = arith.mulf %3, %2 : vector<32x128xf32>
    %c1 = arith.constant 1 : index
    %5 = memref.load %arg0[%c1] : memref<3xf32, #tpu.memory_space<smem>>
    %c1_3 = arith.constant 1 : index
    %c0_4 = arith.constant 0 : index
    %c0_5 = arith.constant 0 : index
    %6 = vector.load %arg2[%c1_3, %c0_4, %c0_5] : memref<3x32x128xf32, #tpu.memory_space<vmem>>, vector<1x32x128xf32>
    %7 = vector.shape_cast %6 : vector<1x32x128xf32> to vector<32x128xf32>
    %8 = vector.broadcast %5 : f32 to vector<32x128xf32>
    %9 = arith.mulf %8, %7 : vector<32x128xf32>
    %10 = arith.addf %4, %9 : vector<32x128xf32>
    %c2 = arith.constant 2 : index
    %11 = memref.load %arg0[%c2] : memref<3xf32, #tpu.memory_space<smem>>
    %c2_6 = arith.constant 2 : index
    %c0_7 = arith.constant 0 : index
    %c0_8 = arith.constant 0 : index
    %12 = vector.load %arg2[%c2_6, %c0_7, %c0_8] : memref<3x32x128xf32, #tpu.memory_space<vmem>>, vector<1x32x128xf32>
    %13 = vector.shape_cast %12 : vector<1x32x128xf32> to vector<32x128xf32>
    %14 = vector.broadcast %11 : f32 to vector<32x128xf32>
    %15 = arith.mulf %14, %13 : vector<32x128xf32>
    %16 = arith.addf %10, %15 : vector<32x128xf32>
    %c0_9 = arith.constant 0 : index
    %c0_10 = arith.constant 0 : index
    %17 = vector.load %arg1[%c0_9, %c0_10] : memref<8x32xf32, #tpu.memory_space<vmem>>, vector<8x32xf32>
    %cst = arith.constant dense<0.000000e+00> : vector<8x128xf32>
    %18 = tpu.matmul %17, %16, %cst {dimension_numbers = #tpu.dot_dimension_numbers<[1], [0], [0], [1], [0, 0, 1, 1], [], []>} : vector<8x32xf32>, vector<32x128xf32>, vector<8x128xf32> -> vector<8x128xf32>
    %c0_11 = arith.constant 0 : index
    %c0_12 = arith.constant 0 : index
    %19 = vector.load %arg3[%c0_11, %c0_12] : memref<1x128xf32, #tpu.memory_space<vmem>>, vector<1x128xf32>
    %20 = vector.broadcast %19 : vector<1x128xf32> to vector<8x128xf32>
    %21 = arith.addf %18, %20 : vector<8x128xf32>
    %c0_13 = arith.constant 0 : index
    %c0_14 = arith.constant 0 : index
    %22 = vector.load %arg4[%c0_13, %c0_14] : memref<8x128xf32, #tpu.memory_space<vmem>>, vector<8x128xf32>
    tpu.vector_store %arg4[%c0_13, %c0_14], %21 {strides = array<i32>} : memref<8x128xf32, #tpu.memory_space<vmem>>, vector<8x128xf32>,
    return
  }
}

</mosaic_0001>

<bundles_post_ra>
// kernel: tpu_custom_call.1
= control target key start
LH: loop header
LB: loop body
LE: loop exit
PB: predicated region body
PF: predicated region fallthrough
CT: control target
= control target key end

     0   :  { %9 = vsyncpa [#allocation5], 0  ;;  %s399_s0 = inlined_call_operand.hbm [shape: f32[3], index: 0, kind: input, shape index: {}]   ;;  %s400_s1 = inlined_call_operand.hbm [shape: f32[8,32], index: 1, kind: input, shape index: {}]   ;;  %s401_s2 = inlined_call_operand.hbm [shape: f32[3,32,128], index: 2, kind: input, shape index: {}]   ;;  %s402_s3 = inlined_call_operand.vmem [shape: f32[1,128], index: 3, kind: input, shape index: {}]   ;;  %s403_s4 = inlined_call_operand.hbm [shape: f32[8,128], index: 4, kind: output, shape index: {}]  }
   0x1   :  { %10 = vsyncpa [#allocation3], 0 }
   0x2   :  { %11 = vsyncpa [#allocation8], 0 }
   0x3   :  { %12 = vsyncpa [#allocation4], 0  ;;  %s230_s17 = scalar_lea.hbm %s399_s0, 16 }
   0x4   :  { %p231_p0 = scmp.ne.s32.totalorder %s399_s0, %s230_s17  ;;  %p234_p1 = scmp.lt.u32.totalorder %s230_s17, %s399_s0 }
   0x6   :  { %p236_p2 = pnand %p234_p1, %p231_p0 }
   0x8   :  { %239 = shalt.err (!%p236_p2)
}
   0x9   :  { %s314_s22 = smov [#allocation2]   ;;  %s315_s25 = smov [#allocation6]  }
   0xa   :  { %20 = dma.hbm_to_smem %s399_s0, 16, %s314_s22, [#allocation5]  }
   0xb   :  { %s27_s26 = sshll.u32 %s315_s25, 4  ;;  %s316_s27 = smov [#allocation7]   ;;  %s28_s26 = int_to_ptr.vmem [resolvable:$true] %s27_s26 }
   0xc   :  { %s36_s28 = sshll.u32 %s316_s27, 4  ;;  %s240_s5 = scalar_lea.hbm %s400_s1, 128  ;;  %s37_s28 = int_to_ptr.vmem [resolvable:$true] %s36_s28 }
   0xd   :  { %p241_p3 = scmp.ne.s32.totalorder %s400_s1, %s240_s5  ;;  %p244_p4 = scmp.lt.u32.totalorder %s240_s5, %s400_s1 }
   0xf   :  { %p246_p5 = pnand %p244_p4, %p241_p3 }
  0x11   :  { %249 = shalt.err (!%p246_p5)
}
  0x12   :  { %s250_s0 = scalar_lea.vmem %s28_s26, 128  ;;  %p255_p7 = scmp.lt.s32.totalorder %s28_s26, %s28_s26 }
  0x13   :  { %p251_p6 = scmp.ne.s32.totalorder %s28_s26, %s250_s0  ;;  %p256_p8 = scmp.lt.s32.totalorder %s250_s0, %s250_s0 }
  0x15   :  { %p257_p9 = por %p256_p8, %p255_p7 }
  0x17   :  { %p258_p10 = pnand %p257_p9, %p251_p6 }
  0x19   :  { %261 = shalt.err (!%p258_p10)
}
  0x1a   :  { %30 = dma.hbm_to_vmem [thread:$0]  %s400_s1, 128, %s28_s26, [#allocation3]  }
  0x1b   :  { %s262_s14 = scalar_lea.hbm %s401_s2, 1536 }
  0x1c   :  { %p263_p11 = scmp.ne.s32.totalorder %s401_s2, %s262_s14  ;;  %p266_p12 = scmp.lt.u32.totalorder %s262_s14, %s401_s2 }
  0x1e   :  { %p268_p13 = pnand %p266_p12, %p263_p11 }
  0x20   :  { %271 = shalt.err (!%p268_p13)
}
  0x21   :  { %s272_s19 = scalar_lea.vmem %s37_s28, 1536  ;;  %p277_p1 = scmp.lt.s32.totalorder %s37_s28, %s37_s28 }
  0x22   :  { %p273_p0 = scmp.ne.s32.totalorder %s37_s28, %s272_s19  ;;  %p278_p2 = scmp.lt.s32.totalorder %s272_s19, %s272_s19 }
  0x24   :  { %p279_p3 = por %p278_p2, %p277_p1 }
  0x26   :  { %p280_p4 = pnand %p279_p3, %p273_p0 }
  0x28   :  { %283 = shalt.err (!%p280_p4)
}
  0x29   :  { %s317_s1 = smov 128   ;;  %s318_s20 = smov 8  }
  0x2a   :  { %42 = dma.hbm_to_vmem [thread:$0]  %s401_s2, 1536, %s37_s28, [#allocation8], %s317_s1, %s317_s1, %s318_s20  }
  0x2b   :  { %306 = dma.done.wait [#allocation5], 16  }
  0x2c   :  { %307 = vsyncadd [#allocation5], 4294967280 }
  0x2d   :  { %308 = dma.done.wait [#allocation3], 128  }
  0x2e   :  { %309 = vsyncadd [#allocation3], 4294967168 }
  0x2f   :  { %310 = dma.done.wait [#allocation8], 1536  }
  0x30   :  { %311 = vsyncadd [#allocation8], 4294965760 }
  0x31   :  { %54 = sfence }
  0x32   :  { %s55_s23 = sld [smem:[#allocation2]]  ;;  %v319_v0 = vmov 0.0|0.0   ;;  %s195_s24 = sld [smem:[#allocation2 + $0x1]]  ;;  %v56_v1 = vld [vmem:[#allocation7] sm:$0xff]  ;;  %vm320_vm0 = vmmov 0   ;;  %v321_v2 = vmov 0.0  }
  0x33   :  { %215 = vmatprep.subr.bf16.mxu0 %v319_v0  ;;  %s196_s25 = sld [smem:[#allocation2 + $0x2]]  ;;  %212 = vmatprep.mubr.msk.f32.mxu0 %vm320_vm0, %v321_v2  ;;  %v57_v3 = vld [vmem:[#allocation7 + $0x8] sm:$0xff]  ;;  %v67_v4 = vld [vmem:[#allocation7 + $0x20] sm:$0xff]  ;;  %v58_v8 = vld [vmem:[#allocation7 + $0x10] sm:$0xff]  ;;  %vm103_vm1 = vcmask 261120   ;;  %s322_s27 = smov [#allocation9]  }
  0x34   :  { %v68_v5 = vld [vmem:[#allocation7 + $0x28] sm:$0xff]  ;;  %v82_v6 = vld [vmem:[#allocation7 + $0x40] sm:$0xff]  ;;  %v59_v10 = vld [vmem:[#allocation7 + $0x18] sm:$0xff]  ;;  %s184_s28 = sshll.u32 %s322_s27, 4  ;;  %s185_s28 = int_to_ptr.vmem [resolvable:$true] %s184_s28 }
  0x35   :  { %v83_v7 = vld [vmem:[#allocation7 + $0x48] sm:$0xff]  ;;  %v69_v11 = vld [vmem:[#allocation7 + $0x30] sm:$0xff]  ;;  %v70_v12 = vld [vmem:[#allocation7 + $0x38] sm:$0xff]  ;;  %s284_s29 = scalar_lea.vmem %s185_s28, 128  ;;  %p289_p6 = scmp.lt.s32.totalorder %s185_s28, %s185_s28 }
  0x36   :  { %v84_v17 = vld [vmem:[#allocation7 + $0x50] sm:$0xff]  ;;  %v85_v18 = vld [vmem:[#allocation7 + $0x58] sm:$0xff]  ;;  %p285_p5 = scmp.ne.s32.totalorder %s185_s28, %s284_s29  ;;  %p290_p7 = scmp.lt.s32.totalorder %s284_s29, %s284_s29 }
  0x37   :  { %v95_v39 = vld [vmem:[#allocation6] sm:$0xff] }
  0x38   :  { %v60_v9 = vstv %s55_s23  ;;  %v71_v15 = vstv %s195_s24  ;;  %v197_v40 = vld [vmem:[%s402_s3] ss:$0 sm:$0xff]  ;;  %p291_p8 = por %p290_p7, %p289_p6 }
  0x39   :  { %v61_v13 = vmul.f32 %v60_v9, %v56_v1  ;;  %v62_v14 = vmul.f32 %v60_v9, %v57_v3  ;;  %v86_v16 = vstv %s196_s25  ;;  %v72_v19 = vmul.f32 %v71_v15, %v67_v4 }
  0x3a   :  { %v73_v20 = vmul.f32 %v71_v15, %v68_v5  ;;  %v87_v21 = vmul.f32 %v86_v16, %v82_v6  ;;  %v88_v22 = vmul.f32 %v86_v16, %v83_v7  ;;  %v63_v23 = vmul.f32 %v60_v9, %v58_v8  ;;  %p292_p9 = pnand %p291_p8, %p285_p5 }
  0x3b   :  { %v64_v24 = vmul.f32 %v60_v9, %v59_v10  ;;  %v74_v25 = vmul.f32 %v71_v15, %v69_v11  ;;  %v75_v26 = vmul.f32 %v71_v15, %v70_v12  ;;  %v76_v27 = vadd.f32 %v72_v19, %v61_v13 }
  0x3c   :  { %v77_v28 = vadd.f32 %v73_v20, %v62_v14  ;;  %v89_v29 = vmul.f32 %v86_v16, %v84_v17  ;;  %v90_v30 = vmul.f32 %v86_v16, %v85_v18 }
  0x3d   :  { %v78_v31 = vadd.f32 %v74_v25, %v63_v23  ;;  %v79_v32 = vadd.f32 %v75_v26, %v64_v24  ;;  %v91_v33 = vadd.f32 %v87_v21, %v76_v27 }
  0x3e   :  { %v92_v34 = vadd.f32 %v88_v22, %v77_v28 }
  0x3f   :  { %v93_v35 = vadd.f32 %v89_v29, %v78_v31  ;;  %v94_v36 = vadd.f32 %v90_v30, %v79_v32 }
  0x40   :  { %v216_v37 = vpack.c.bf16 %v92_v34, %v91_v33 }
  0x41   :  { %v219_v38 = vpack.c.bf16 %v94_v36, %v93_v35 }
  0x42   :  { %217 = vmatpush3.bf16.msra.mxu0 %v216_v37 }
  0x43   :  { %218 = vmatprep.subr.bf16.mxu0 %v319_v0 }
  0x46   :  { %220 = vmatpush3.bf16.msra.mxu0 %v219_v38 }
  0x49   :  { %213 = vmatmul.mubr.msk.f32.vlgmr.msra.gmra.mrb[0].mxu0 %vm103_vm1, %v95_v39 }
 0x11c   :  { %v173_v41 = vpop.f32.mrb[0].mxu0 }
 0x11d   :  { %v174_v42 = vadd.f32 %v197_v40, %v173_v41  ;;  %v214_v43 = vpop.f32.mrb[1].mxu0 }
 0x11f   :  { %177 = vst [vmem:[#allocation9] sm:$0xff] %v174_v42 }
 0x120   :  { %295 = shalt.err (!%p292_p9)
}
 0x121   :  { %s296_s6 = scalar_lea.hbm %s403_s4, 128 }
 0x122   :  { %p297_p10 = scmp.ne.s32.totalorder %s403_s4, %s296_s6  ;;  %p300_p11 = scmp.lt.u32.totalorder %s296_s6, %s403_s4 }
 0x124   :  { %p302_p12 = pnand %p300_p11, %p297_p10 }
 0x126   :  { %305 = shalt.err (!%p302_p12)
}
 0x127   :  { %187 = dma.vmem_to_hbm [thread:$0]  %s185_s28, 128, %s403_s4, [#allocation4]  }
 0x128   :  { %312 = dma.done.wait [#allocation4], 128  }
 0x129   :  { %313 = vsyncadd [#allocation4], 4294967168 }
 0x12a   :  { %191 = vsyncpa [#allocation3], 1 }
 0x12b   :  { %192 = vsyncpa [#allocation8], 1 }
 0x12c   :  { %193 = vsyncpa [#allocation4], 1 }
 0x12d   :  { %194 = vsyncpa [#allocation5], 1 }

</bundles_post_ra>
